<compile_context>
chip_gen: v7x
topology: tpu7x:2x2x1
jax: 0.10.0
libtpu: 0.0.40
codegen_flags: <defaults>
</compile_context>

<pallas_src>
import jax
import jax.numpy as jnp
from jax.experimental import pallas as pl
from jax.experimental.pallas import tpu as pltpu

MODALITIES = ("eeg", "audio", "text")
INPUT_DIMS = {"eeg": 32, "audio": 48, "text": 64}
H = 32                 # modality_hidden_dims[-1]
SHARED = (32, 16)      # shared_hidden_dims
NUM_CLASSES = 1
BATCH = 8
BN_EPS = 1e-5

NMOD = len(MODALITIES)
PAIRS = tuple((i, j) for i in range(NMOD) for j in range(NMOD) if i != j)  # PyTorch order
NPAIR = len(PAIRS)                                  # 6
IN_TOTAL = sum(INPUT_DIMS[m] for m in MODALITIES)   # 144
ENC_OUT = NMOD * H                                  # 96
ATT_H = NPAIR * H                                   # 192

SLAB_COLS = max(ENC_OUT, ATT_H, SHARED[0], SHARED[1], NUM_CLASSES)  # 192

# Row layout inside the packed weight slab (all offsets are multiples of 8).
R_ENC = 0                       # (144, 96)  block-diag encoder weights (BN folded)
R_W1 = R_ENC + IN_TOTAL         # (96, 192)  all six attention hidden layers
R_WF = R_W1 + ENC_OUT           # (96, 32)   fusion layer (shared BN0 folded)
R_WS1 = R_WF + ENC_OUT          # (32, 16)   shared hidden layer (BN folded)
R_WFIN = R_WS1 + SHARED[0]      # (16, 1)    final head
R_BIAS = R_WFIN + SHARED[1]     # 8 rows: biases + packed gate-projection vectors
SLAB_ROWS = R_BIAS + 8          # 392

# Rows inside the bias region.
B_ENC, B_W1, B_W2, B_WF, B_WS1, B_WFIN, B_W2V = range(7)   # B_W2V: 6 gate w2 vectors


# ----------------------------------------------------------------------------
# Pallas kernel: whole forward pass fused, 2 input refs, 1 output ref.
# ----------------------------------------------------------------------------
def _fused_forward_kernel(x_ref, w_ref, o_ref):
    f32 = jnp.float32
    x = x_ref[...]                                                 # (B, 144)

    def bias(row, width):
        return w_ref[R_BIAS + row:R_BIAS + row + 1, 0:width]       # (1, width)

    # 1) All three modality encoders: one block-diagonal matmul.
    #    Linear + eval-BatchNorm folded into W/b; Dropout = identity.
    enc = jnp.dot(x, w_ref[R_ENC:R_ENC + IN_TOTAL, 0:ENC_OUT],
                  preferred_element_type=f32) + bias(B_ENC, ENC_OUT)
    enc = jnp.maximum(enc, 0.0)                                    # (B, 96) lane-contiguous

    # 2) All six cross-attention hidden layers: one matmul + one tanh.
    a = jnp.tanh(jnp.dot(enc, w_ref[R_W1:R_W1 + ENC_OUT, 0:ATT_H],
                         preferred_element_type=f32) + bias(B_W1, ATT_H))   # (B, 192)

    # 3) All six gate projections without a block-diag weight block:
    #    elementwise multiply by the packed (1,192) w2 row, then six 32-lane
    #    reductions (XLU) -> per-pair (B,1) gates.
    t = a * w_ref[R_BIAS + B_W2V:R_BIAS + B_W2V + 1, 0:ATT_H]      # (B, 192)

    def gate(p):
        seg_sum = jnp.sum(t[:, p * H:(p + 1) * H], axis=-1, keepdims=True)   # (B, 1)
        b2 = w_ref[R_BIAS + B_W2:R_BIAS + B_W2 + 1, p:p + 1]                 # (1, 1)
        return jax.nn.sigmoid(seg_sum + b2)

    g = [gate(p) for p in range(NPAIR)]

    # 4) Gated cross-modal mixing (pair order matches the PyTorch loop:
    #    (e,a),(e,t),(a,e),(a,t),(t,e),(t,a)).
    enc_e = enc[:, 0 * H:1 * H]
    enc_a = enc[:, 1 * H:2 * H]
    enc_t = enc[:, 2 * H:3 * H]
    att_e = enc_e + g[0] * enc_a + g[1] * enc_t
    att_a = enc_a + g[2] * enc_e + g[3] * enc_t
    att_t = enc_t + g[4] * enc_e + g[5] * enc_a

    # 5) Fusion layer: accumulate per-modality weight slices (no concatenate);
    #    shared BN0 is already folded into these weights.
    h = (jnp.dot(att_e, w_ref[R_WF + 0 * H:R_WF + 1 * H, 0:SHARED[0]],
                 preferred_element_type=f32)
         + jnp.dot(att_a, w_ref[R_WF + 1 * H:R_WF + 2 * H, 0:SHARED[0]],
                   preferred_element_type=f32)
         + jnp.dot(att_t, w_ref[R_WF + 2 * H:R_WF + 3 * H, 0:SHARED[0]],
                   preferred_element_type=f32)
         + bias(B_WF, SHARED[0]))
    h = jnp.maximum(h, 0.0)                                        # (B, 32)

    # 6) Shared hidden layer (BN folded) + final head.
    h = jnp.maximum(jnp.dot(h, w_ref[R_WS1:R_WS1 + SHARED[0], 0:SHARED[1]],
                            preferred_element_type=f32) + bias(B_WS1, SHARED[1]),
                    0.0)                                           # (B, 16)
    out = jnp.dot(h, w_ref[R_WFIN:R_WFIN + SHARED[1], 0:NUM_CLASSES],
                  preferred_element_type=f32) + bias(B_WFIN, NUM_CLASSES)
    o_ref[...] = out.astype(o_ref.dtype)


def cross_modal_attention_fusion(x_slab, w_slab):
    return pl.pallas_call(
        _fused_forward_kernel,
        out_shape=jax.ShapeDtypeStruct((BATCH, NUM_CLASSES), jnp.float32),
        in_specs=[pl.BlockSpec(memory_space=pltpu.MemorySpace.VMEM)] * 2,
        out_specs=pl.BlockSpec(memory_space=pltpu.MemorySpace.VMEM),
    )(x_slab, w_slab)


# ----------------------------------------------------------------------------
# Plain-JAX glue: parameter folding + slab packing (done once, outside kernel)
# ----------------------------------------------------------------------------
def _fold_bn(w, b, gamma, beta, mean, var):
    scale = gamma / jnp.sqrt(var + BN_EPS)
    return w * scale[None, :], b * scale + beta - mean * scale


def pack_params(params):
    w = jnp.zeros((SLAB_ROWS, SLAB_COLS), jnp.float32)

    # Modality encoders: block-diagonal, Linear+BN folded.
    r = R_ENC
    for m_idx, m in enumerate(MODALITIES):
        e = params["enc"][m]
        wf, bf = _fold_bn(e["w"], e["b"], *e["bn"])
        din = INPUT_DIMS[m]
        c = m_idx * H
        w = w.at[r:r + din, c:c + H].set(wf)
        w = w.at[R_BIAS + B_ENC, c:c + H].set(bf)
        r += din

    # Cross-attention: six pair MLPs.  For pair p=(i,j): column block p of
    # W1_all gets W1[:H] at modality-i rows and W1[H:] at modality-j rows, so
    # enc @ W1_all == cat(enc_i, enc_j) @ W1.  The (H,1) gate-projection
    # vectors are packed into a single 192-wide row (no block-diag storage).
    for p_idx, (i, j) in enumerate(PAIRS):
        a = params["attn"][(MODALITIES[i], MODALITIES[j])]
        c = p_idx * H
        w = w.at[R_W1 + i * H:R_W1 + (i + 1) * H, c:c + H].set(a["w1"][:H, :])
        w = w.at[R_W1 + j * H:R_W1 + (j + 1) * H, c:c + H].set(a["w1"][H:, :])
        w = w.at[R_BIAS + B_W1, c:c + H].set(a["b1"])
        w = w.at[R_BIAS + B_W2V, c:c + H].set(a["w2"][:, 0])
        w = w.at[R_BIAS + B_W2, p_idx].set(a["b2"][0])

    # Fusion layer with shared BN0 folded in.
    wf, bf = _fold_bn(params["fusion"]["w"], params["fusion"]["b"], *params["shared_bn0"])
    w = w.at[R_WF:R_WF + ENC_OUT, 0:SHARED[0]].set(wf)
    w = w.at[R_BIAS + B_WF, 0:SHARED[0]].set(bf)

    # Shared hidden layer with its BN folded in.
    blk = params["shared_lin"][0]
    wf, bf = _fold_bn(blk["w"], blk["b"], *blk["bn"])
    w = w.at[R_WS1:R_WS1 + SHARED[0], 0:SHARED[1]].set(wf)
    w = w.at[R_BIAS + B_WS1, 0:SHARED[1]].set(bf)

    # Final head.
    w = w.at[R_WFIN:R_WFIN + SHARED[1], 0:NUM_CLASSES].set(params["final"]["w"])
    w = w.at[R_BIAS + B_WFIN, 0:NUM_CLASSES].set(params["final"]["b"])
    return w


def pack_inputs(x_dict):
    return jnp.concatenate([x_dict[m] for m in MODALITIES], axis=1)   # (B, 144)


# ----------------------------------------------------------------------------
# Deterministic synthetic parameters (raw, PyTorch-structured)
# ----------------------------------------------------------------------------
def init_params(key):
    keys = iter(jax.random.split(key, 64))

    def nk():
        return next(keys)

    def linear(din, dout):
        w = jax.random.normal(nk(), (din, dout), jnp.float32) / jnp.sqrt(float(din))
        b = 0.01 * jax.random.normal(nk(), (dout,), jnp.float32)
        return w, b

    def bn(dim):
        gamma = 1.0 + 0.1 * jax.random.normal(nk(), (dim,), jnp.float32)
        beta = 0.1 * jax.random.normal(nk(), (dim,), jnp.float32)
        mean = 0.1 * jax.random.normal(nk(), (dim,), jnp.float32)
        var = 0.5 + jax.random.uniform(nk(), (dim,), jnp.float32)
        return (gamma, beta, mean, var)

    params = {"enc": {}, "attn": {}}
    for m in MODALITIES:
        w, b = linear(INPUT_DIMS[m], H)
        params["enc"][m] = {"w": w, "b": b, "bn": bn(H)}
    for (i, j) in PAIRS:
        w1, b1 = linear(2 * H, H)
        w2, b2 = linear(H, 1)
        params["attn"][(MODALITIES[i], MODALITIES[j])] = {"w1": w1, "b1": b1, "w2": w2, "b2": b2}
    w, b = linear(NMOD * H, SHARED[0])
    params["fusion"] = {"w": w, "b": b}
    params["shared_bn0"] = bn(SHARED[0])
    params["shared_lin"] = []
    for k in range(len(SHARED) - 1):
        w, b = linear(SHARED[k], SHARED[k + 1])
        params["shared_lin"].append({"w": w, "b": b, "bn": bn(SHARED[k + 1])})
    w, b = linear(SHARED[-1], NUM_CLASSES)
    params["final"] = {"w": w, "b": b}
    return params


# ----------------------------------------------------------------------------
# Pure-JAX reference (eval-mode, unfolded) for correctness check
# ----------------------------------------------------------------------------
def _bn_eval(x, gamma, beta, mean, var):
    return (x - mean) / jnp.sqrt(var + BN_EPS) * gamma + beta


def reference_forward(x_dict, params):
    encoded = {}
    for m in MODALITIES:
        e = params["enc"][m]
        encoded[m] = jnp.maximum(_bn_eval(x_dict[m] @ e["w"] + e["b"], *e["bn"]), 0.0)
    attended = {}
    for i, mi in enumerate(MODALITIES):
        acc = encoded[mi]
        for j, mj in enumerate(MODALITIES):
            if i == j:
                continue
            a = params["attn"][(mi, mj)]
            cat = jnp.concatenate([encoded[mi], encoded[mj]], axis=1)
            gate = jax.nn.sigmoid(jnp.tanh(cat @ a["w1"] + a["b1"]) @ a["w2"] + a["b2"])
            acc = acc + gate * encoded[mj]
        attended[mi] = acc
    fused = jnp.concatenate([attended[m] for m in MODALITIES], axis=1)
    h = fused @ params["fusion"]["w"] + params["fusion"]["b"]
    h = jnp.maximum(_bn_eval(h, *params["shared_bn0"]), 0.0)
    for blk in params["shared_lin"]:
        h = jnp.maximum(_bn_eval(h @ blk["w"] + blk["b"], *blk["bn"]), 0.0)
    return h @ params["final"]["w"] + params["final"]["b"]


if __name__ == "__main__":
    key = jax.random.PRNGKey(0)
    kp, kx = jax.random.split(key)
    params = init_params(kp)

    x_dict = {}
    for m in MODALITIES:
        kx, sub = jax.random.split(kx)
        x_dict[m] = jax.random.normal(sub, (BATCH, INPUT_DIMS[m]), jnp.float32)

    w_slab = pack_params(params)      # (392, 192) single weight/bias slab
    x_slab = pack_inputs(x_dict)      # (8, 144) single input slab

    out = cross_modal_attention_fusion(x_slab, w_slab)
    out = jax.block_until_ready(out)

    ref = reference_forward(x_dict, params)
    assert out.shape == (BATCH, NUM_CLASSES), out.shape
    assert jnp.allclose(out, ref, atol=1e-3, rtol=1e-3), (out, ref)
    print("KERNEL_OK")
</pallas_src>

<mosaic_0001>
module attributes {stable_mosaic.version = 11 : i64} {
  func.func @_fused_forward_kernel(%arg0: memref<8x144xf32, #tpu.memory_space<vmem>>, %arg1: memref<392x192xf32, #tpu.memory_space<vmem>>, %arg2: memref<8x1xf32, #tpu.memory_space<vmem>>) attributes {dimension_semantics = [], scalar_prefetch = 0 : i64, scratch_operands = 0 : i64, tpu.core_type = #tpu.core_type<tc>} {
    %c0 = arith.constant 0 : index
    %c0_0 = arith.constant 0 : index
    %0 = vector.load %arg0[%c0, %c0_0] : memref<8x144xf32, #tpu.memory_space<vmem>>, vector<8x144xf32>
    %c0_1 = arith.constant 0 : index
    %c0_2 = arith.constant 0 : index
    %1 = vector.load %arg1[%c0_1, %c0_2] : memref<392x192xf32, #tpu.memory_space<vmem>>, vector<144x96xf32>
    %cst = arith.constant dense<0.000000e+00> : vector<8x96xf32>
    %2 = tpu.matmul %0, %1, %cst {dimension_numbers = #tpu.dot_dimension_numbers<[1], [0], [0], [1], [0, 0, 1, 1], [], []>} : vector<8x144xf32>, vector<144x96xf32>, vector<8x96xf32> -> vector<8x96xf32>
    %c384 = arith.constant 384 : index
    %c0_3 = arith.constant 0 : index
    %3 = vector.load %arg1[%c384, %c0_3] : memref<392x192xf32, #tpu.memory_space<vmem>>, vector<1x96xf32>
    %4 = vector.broadcast %3 : vector<1x96xf32> to vector<8x96xf32>
    %5 = arith.addf %2, %4 : vector<8x96xf32>
    %cst_4 = arith.constant 0.000000e+00 : f32
    %6 = vector.broadcast %cst_4 : f32 to vector<8x96xf32>
    %7 = arith.maximumf %5, %6 : vector<8x96xf32>
    %c144 = arith.constant 144 : index
    %c0_5 = arith.constant 0 : index
    %8 = vector.load %arg1[%c144, %c0_5] : memref<392x192xf32, #tpu.memory_space<vmem>>, vector<96x192xf32>
    %cst_6 = arith.constant dense<0.000000e+00> : vector<8x192xf32>
    %9 = tpu.matmul %7, %8, %cst_6 {dimension_numbers = #tpu.dot_dimension_numbers<[1], [0], [0], [1], [0, 0, 1, 1], [], []>} : vector<8x96xf32>, vector<96x192xf32>, vector<8x192xf32> -> vector<8x192xf32>
    %c385 = arith.constant 385 : index
    %c0_7 = arith.constant 0 : index
    %10 = vector.load %arg1[%c385, %c0_7] : memref<392x192xf32, #tpu.memory_space<vmem>>, vector<1x192xf32>
    %11 = vector.broadcast %10 : vector<1x192xf32> to vector<8x192xf32>
    %12 = arith.addf %9, %11 : vector<8x192xf32>
    %13 = math.tanh %12 : vector<8x192xf32>
    %c390 = arith.constant 390 : index
    %c0_8 = arith.constant 0 : index
    %14 = vector.load %arg1[%c390, %c0_8] : memref<392x192xf32, #tpu.memory_space<vmem>>, vector<1x192xf32>
    %15 = vector.broadcast %14 : vector<1x192xf32> to vector<8x192xf32>
    %16 = arith.mulf %13, %15 : vector<8x192xf32>
    %17 = vector.extract_strided_slice %16 {offsets = [0, 0], sizes = [8, 32], strides = [1, 1]} : vector<8x192xf32> to vector<8x32xf32>
    %cst_9 = arith.constant dense<0.000000e+00> : vector<8xf32>
    %18 = vector.multi_reduction <add>, %17, %cst_9 [1] : vector<8x32xf32> to vector<8xf32>
    %19 = vector.shape_cast %18 : vector<8xf32> to vector<8x1xf32>
    %c386 = arith.constant 386 : index
    %c0_10 = arith.constant 0 : index
    %20 = vector.load %arg1[%c386, %c0_10] : memref<392x192xf32, #tpu.memory_space<vmem>>, vector<1x1xf32>
    %21 = vector.broadcast %20 : vector<1x1xf32> to vector<8x1xf32>
    %22 = arith.addf %19, %21 : vector<8x1xf32>
    %23 = arith.negf %22 : vector<8x1xf32>
    %24 = math.exp %23 : vector<8x1xf32>
    %cst_11 = arith.constant 1.000000e+00 : f32
    %25 = vector.broadcast %cst_11 : f32 to vector<8x1xf32>
    %26 = arith.addf %25, %24 : vector<8x1xf32>
    %27 = arith.divf %25, %26 : vector<8x1xf32>
    %28 = vector.extract_strided_slice %16 {offsets = [0, 32], sizes = [8, 32], strides = [1, 1]} : vector<8x192xf32> to vector<8x32xf32>
    %cst_12 = arith.constant dense<0.000000e+00> : vector<8xf32>
    %29 = vector.multi_reduction <add>, %28, %cst_12 [1] : vector<8x32xf32> to vector<8xf32>
    %30 = vector.shape_cast %29 : vector<8xf32> to vector<8x1xf32>
    %c386_13 = arith.constant 386 : index
    %c1 = arith.constant 1 : index
    %31 = vector.load %arg1[%c386_13, %c1] : memref<392x192xf32, #tpu.memory_space<vmem>>, vector<1x1xf32>
    %32 = vector.broadcast %31 : vector<1x1xf32> to vector<8x1xf32>
    %33 = arith.addf %30, %32 : vector<8x1xf32>
    %34 = arith.negf %33 : vector<8x1xf32>
    %35 = math.exp %34 : vector<8x1xf32>
    %cst_14 = arith.constant 1.000000e+00 : f32
    %36 = vector.broadcast %cst_14 : f32 to vector<8x1xf32>
    %37 = arith.addf %36, %35 : vector<8x1xf32>
    %38 = arith.divf %36, %37 : vector<8x1xf32>
    %39 = vector.extract_strided_slice %16 {offsets = [0, 64], sizes = [8, 32], strides = [1, 1]} : vector<8x192xf32> to vector<8x32xf32>
    %cst_15 = arith.constant dense<0.000000e+00> : vector<8xf32>
    %40 = vector.multi_reduction <add>, %39, %cst_15 [1] : vector<8x32xf32> to vector<8xf32>
    %41 = vector.shape_cast %40 : vector<8xf32> to vector<8x1xf32>
    %c386_16 = arith.constant 386 : index
    %c2 = arith.constant 2 : index
    %42 = vector.load %arg1[%c386_16, %c2] : memref<392x192xf32, #tpu.memory_space<vmem>>, vector<1x1xf32>
    %43 = vector.broadcast %42 : vector<1x1xf32> to vector<8x1xf32>
    %44 = arith.addf %41, %43 : vector<8x1xf32>
    %45 = arith.negf %44 : vector<8x1xf32>
    %46 = math.exp %45 : vector<8x1xf32>
    %cst_17 = arith.constant 1.000000e+00 : f32
    %47 = vector.broadcast %cst_17 : f32 to vector<8x1xf32>
    %48 = arith.addf %47, %46 : vector<8x1xf32>
    %49 = arith.divf %47, %48 : vector<8x1xf32>
    %50 = vector.extract_strided_slice %16 {offsets = [0, 96], sizes = [8, 32], strides = [1, 1]} : vector<8x192xf32> to vector<8x32xf32>
    %cst_18 = arith.constant dense<0.000000e+00> : vector<8xf32>
    %51 = vector.multi_reduction <add>, %50, %cst_18 [1] : vector<8x32xf32> to vector<8xf32>
    %52 = vector.shape_cast %51 : vector<8xf32> to vector<8x1xf32>
    %c386_19 = arith.constant 386 : index
    %c3 = arith.constant 3 : index
    %53 = vector.load %arg1[%c386_19, %c3] : memref<392x192xf32, #tpu.memory_space<vmem>>, vector<1x1xf32>
    %54 = vector.broadcast %53 : vector<1x1xf32> to vector<8x1xf32>
    %55 = arith.addf %52, %54 : vector<8x1xf32>
    %56 = arith.negf %55 : vector<8x1xf32>
    %57 = math.exp %56 : vector<8x1xf32>
    %cst_20 = arith.constant 1.000000e+00 : f32
    %58 = vector.broadcast %cst_20 : f32 to vector<8x1xf32>
    %59 = arith.addf %58, %57 : vector<8x1xf32>
    %60 = arith.divf %58, %59 : vector<8x1xf32>
    %61 = vector.extract_strided_slice %16 {offsets = [0, 128], sizes = [8, 32], strides = [1, 1]} : vector<8x192xf32> to vector<8x32xf32>
    %cst_21 = arith.constant dense<0.000000e+00> : vector<8xf32>
    %62 = vector.multi_reduction <add>, %61, %cst_21 [1] : vector<8x32xf32> to vector<8xf32>
    %63 = vector.shape_cast %62 : vector<8xf32> to vector<8x1xf32>
    %c386_22 = arith.constant 386 : index
    %c4 = arith.constant 4 : index
    %64 = vector.load %arg1[%c386_22, %c4] : memref<392x192xf32, #tpu.memory_space<vmem>>, vector<1x1xf32>
    %65 = vector.broadcast %64 : vector<1x1xf32> to vector<8x1xf32>
    %66 = arith.addf %63, %65 : vector<8x1xf32>
    %67 = arith.negf %66 : vector<8x1xf32>
    %68 = math.exp %67 : vector<8x1xf32>
    %cst_23 = arith.constant 1.000000e+00 : f32
    %69 = vector.broadcast %cst_23 : f32 to vector<8x1xf32>
    %70 = arith.addf %69, %68 : vector<8x1xf32>
    %71 = arith.divf %69, %70 : vector<8x1xf32>
    %72 = vector.extract_strided_slice %16 {offsets = [0, 160], sizes = [8, 32], strides = [1, 1]} : vector<8x192xf32> to vector<8x32xf32>
    %cst_24 = arith.constant dense<0.000000e+00> : vector<8xf32>
    %73 = vector.multi_reduction <add>, %72, %cst_24 [1] : vector<8x32xf32> to vector<8xf32>
    %74 = vector.shape_cast %73 : vector<8xf32> to vector<8x1xf32>
    %c386_25 = arith.constant 386 : index
    %c5 = arith.constant 5 : index
    %75 = vector.load %arg1[%c386_25, %c5] : memref<392x192xf32, #tpu.memory_space<vmem>>, vector<1x1xf32>
    %76 = vector.broadcast %75 : vector<1x1xf32> to vector<8x1xf32>
    %77 = arith.addf %74, %76 : vector<8x1xf32>
    %78 = arith.negf %77 : vector<8x1xf32>
    %79 = math.exp %78 : vector<8x1xf32>
    %cst_26 = arith.constant 1.000000e+00 : f32
    %80 = vector.broadcast %cst_26 : f32 to vector<8x1xf32>
    %81 = arith.addf %80, %79 : vector<8x1xf32>
    %82 = arith.divf %80, %81 : vector<8x1xf32>
    %83 = vector.extract_strided_slice %7 {offsets = [0, 0], sizes = [8, 32], strides = [1, 1]} : vector<8x96xf32> to vector<8x32xf32>
    %84 = vector.extract_strided_slice %7 {offsets = [0, 32], sizes = [8, 32], strides = [1, 1]} : vector<8x96xf32> to vector<8x32xf32>
    %85 = vector.extract_strided_slice %7 {offsets = [0, 64], sizes = [8, 32], strides = [1, 1]} : vector<8x96xf32> to vector<8x32xf32>
    %86 = vector.broadcast %27 : vector<8x1xf32> to vector<8x32xf32>
    %87 = arith.mulf %86, %84 : vector<8x32xf32>
    %88 = arith.addf %83, %87 : vector<8x32xf32>
    %89 = vector.broadcast %38 : vector<8x1xf32> to vector<8x32xf32>
    %90 = arith.mulf %89, %85 : vector<8x32xf32>
    %91 = arith.addf %88, %90 : vector<8x32xf32>
    %92 = vector.broadcast %49 : vector<8x1xf32> to vector<8x32xf32>
    %93 = arith.mulf %92, %83 : vector<8x32xf32>
    %94 = arith.addf %84, %93 : vector<8x32xf32>
    %95 = vector.broadcast %60 : vector<8x1xf32> to vector<8x32xf32>
    %96 = arith.mulf %95, %85 : vector<8x32xf32>
    %97 = arith.addf %94, %96 : vector<8x32xf32>
    %98 = vector.broadcast %71 : vector<8x1xf32> to vector<8x32xf32>
    %99 = arith.mulf %98, %83 : vector<8x32xf32>
    %100 = arith.addf %85, %99 : vector<8x32xf32>
    %101 = vector.broadcast %82 : vector<8x1xf32> to vector<8x32xf32>
    %102 = arith.mulf %101, %84 : vector<8x32xf32>
    %103 = arith.addf %100, %102 : vector<8x32xf32>
    %c240 = arith.constant 240 : index
    %c0_27 = arith.constant 0 : index
    %104 = vector.load %arg1[%c240, %c0_27] : memref<392x192xf32, #tpu.memory_space<vmem>>, vector<32x32xf32>
    %cst_28 = arith.constant dense<0.000000e+00> : vector<8x32xf32>
    %105 = tpu.matmul %91, %104, %cst_28 {dimension_numbers = #tpu.dot_dimension_numbers<[1], [0], [0], [1], [0, 0, 1, 1], [], []>} : vector<8x32xf32>, vector<32x32xf32>, vector<8x32xf32> -> vector<8x32xf32>
    %c272 = arith.constant 272 : index
    %c0_29 = arith.constant 0 : index
    %106 = vector.load %arg1[%c272, %c0_29] : memref<392x192xf32, #tpu.memory_space<vmem>>, vector<32x32xf32>
    %cst_30 = arith.constant dense<0.000000e+00> : vector<8x32xf32>
    %107 = tpu.matmul %97, %106, %cst_30 {dimension_numbers = #tpu.dot_dimension_numbers<[1], [0], [0], [1], [0, 0, 1, 1], [], []>} : vector<8x32xf32>, vector<32x32xf32>, vector<8x32xf32> -> vector<8x32xf32>
    %108 = arith.addf %105, %107 : vector<8x32xf32>
    %c304 = arith.constant 304 : index
    %c0_31 = arith.constant 0 : index
    %109 = vector.load %arg1[%c304, %c0_31] : memref<392x192xf32, #tpu.memory_space<vmem>>, vector<32x32xf32>
    %cst_32 = arith.constant dense<0.000000e+00> : vector<8x32xf32>
    %110 = tpu.matmul %103, %109, %cst_32 {dimension_numbers = #tpu.dot_dimension_numbers<[1], [0], [0], [1], [0, 0, 1, 1], [], []>} : vector<8x32xf32>, vector<32x32xf32>, vector<8x32xf32> -> vector<8x32xf32>
    %111 = arith.addf %108, %110 : vector<8x32xf32>
    %c387 = arith.constant 387 : index
    %c0_33 = arith.constant 0 : index
    %112 = vector.load %arg1[%c387, %c0_33] : memref<392x192xf32, #tpu.memory_space<vmem>>, vector<1x32xf32>
    %113 = vector.broadcast %112 : vector<1x32xf32> to vector<8x32xf32>
    %114 = arith.addf %111, %113 : vector<8x32xf32>
    %cst_34 = arith.constant 0.000000e+00 : f32
    %115 = vector.broadcast %cst_34 : f32 to vector<8x32xf32>
    %116 = arith.maximumf %114, %115 : vector<8x32xf32>
    %c336 = arith.constant 336 : index
    %c0_35 = arith.constant 0 : index
    %117 = vector.load %arg1[%c336, %c0_35] : memref<392x192xf32, #tpu.memory_space<vmem>>, vector<32x16xf32>
    %cst_36 = arith.constant dense<0.000000e+00> : vector<8x16xf32>
    %118 = tpu.matmul %116, %117, %cst_36 {dimension_numbers = #tpu.dot_dimension_numbers<[1], [0], [0], [1], [0, 0, 1, 1], [], []>} : vector<8x32xf32>, vector<32x16xf32>, vector<8x16xf32> -> vector<8x16xf32>
    %c388 = arith.constant 388 : index
    %c0_37 = arith.constant 0 : index
    %119 = vector.load %arg1[%c388, %c0_37] : memref<392x192xf32, #tpu.memory_space<vmem>>, vector<1x16xf32>
    %120 = vector.broadcast %119 : vector<1x16xf32> to vector<8x16xf32>
    %121 = arith.addf %118, %120 : vector<8x16xf32>
    %cst_38 = arith.constant 0.000000e+00 : f32
    %122 = vector.broadcast %cst_38 : f32 to vector<8x16xf32>
    %123 = arith.maximumf %121, %122 : vector<8x16xf32>
    %c368 = arith.constant 368 : index
    %c0_39 = arith.constant 0 : index
    %124 = vector.load %arg1[%c368, %c0_39] : memref<392x192xf32, #tpu.memory_space<vmem>>, vector<16x1xf32>
    %cst_40 = arith.constant dense<0.000000e+00> : vector<8x1xf32>
    %125 = tpu.matmul %123, %124, %cst_40 {dimension_numbers = #tpu.dot_dimension_numbers<[1], [0], [0], [1], [0, 0, 1, 1], [], []>} : vector<8x16xf32>, vector<16x1xf32>, vector<8x1xf32> -> vector<8x1xf32>
    %c389 = arith.constant 389 : index
    %c0_41 = arith.constant 0 : index
    %126 = vector.load %arg1[%c389, %c0_41] : memref<392x192xf32, #tpu.memory_space<vmem>>, vector<1x1xf32>
    %127 = vector.broadcast %126 : vector<1x1xf32> to vector<8x1xf32>
    %128 = arith.addf %125, %127 : vector<8x1xf32>
    %c0_42 = arith.constant 0 : index
    %c0_43 = arith.constant 0 : index
    %129 = vector.load %arg2[%c0_42, %c0_43] : memref<8x1xf32, #tpu.memory_space<vmem>>, vector<8x1xf32>
    tpu.vector_store %arg2[%c0_42, %c0_43], %128 {strides = array<i32>} : memref<8x1xf32, #tpu.memory_space<vmem>>, vector<8x1xf32>,
    return
  }
}

</mosaic_0001>

<bundles_post_ra>
// kernel: tpu_custom_call.1
= control target key start
LH: loop header
LB: loop body
LE: loop exit
PB: predicated region body
PF: predicated region fallthrough
CT: control target
= control target key end

     0   :  { %v992_v0 = vmov 0.0|0.0   ;;  %vm32_vm0 = vcmask 130048   ;;  %vm144_vm1 = vcmask 785408   ;;  %s994_s18 = smov 64   ;;  %s995_s19 = smov 96   ;;  %vm236_vm2 = vcmask 261120   ;;  %s1294_s1 = inlined_call_operand.vmem [shape: f32[392,192], index: 1, kind: input, shape index: {}]   ;;  %s1295_s0 = inlined_call_operand.vmem [shape: f32[8,144], index: 0, kind: input, shape index: {}]   ;;  %s1296_s2 = inlined_call_operand.vmem [shape: f32[8,1], index: 2, kind: output, shape index: {}]  }
   0x1   :  { %867 = vmatprep.subr.bf16.mxu0 %v992_v0  ;;  %v13_v1 = vld [vmem:[%s1294_s1] sm:$0xff]  ;;  %v14_v2 = vld [vmem:[%s1294_s1 + $0x10] sm:$0xff]  ;;  %v12_v11 = vld [vmem:[%s1295_s0 + $0x8] sm:$0xff]  ;;  %s996_s20 = smov 32   ;;  %vm1003_vm3 = vmmov 0   ;;  %vm772_vm4 = vcmask 7168  }
   0x2   :  { %v15_v3 = vld [vmem:[%s1294_s1 + $0x20] sm:$0xff]  ;;  %v868_v4 = vpack.c.bf16 %v14_v2, %v13_v1  ;;  %v16_v5 = vld [vmem:[%s1294_s1 + $0x30] sm:$0xff]  ;;  %v108_v12 = vld [vmem:[%s1294_s1 + $0x128] sm:$0xff]  ;;  %778 = vmatprep.mubr.msk.f32.mxu0 %vm32_vm0, %v12_v11 }
   0x3   :  { %v871_v6 = vpack.c.bf16 %v16_v5, %v15_v3  ;;  %v17_v7 = vld [vmem:[%s1294_s1 + $0x40] sm:$0xff]  ;;  %v18_v8 = vld [vmem:[%s1294_s1 + $0x50] sm:$0xff]  ;;  %v110_v14 = vld [vmem:[%s1294_s1 + $0x138] sm:$0xff]  ;;  %v993_v3 = vmov 0.0  }
   0x4   :  { %869 = vmatpush1.bf16.msra.mxu0 %v868_v4  ;;  %v19_v9 = vld [vmem:[%s1294_s1 + $0x60] sm:$0xff]  ;;  %v20_v10 = vld [vmem:[%s1294_s1 + $0x70] sm:$0xff]  ;;  %v874_v13 = vpack.c.bf16 %v18_v8, %v17_v7  ;;  %v894_v17 = vpack.c.bf16 %v110_v14, %v108_v12  ;;  %v112_v19 = vld [vmem:[%s1294_s1 + $0x148] sm:$0xff]  ;;  %212 = vmatprep.mubr.f32.mxu1 %v993_v3 }
   0x5   :  { %870 = vmatprep.subr.bf16.mxu0 %v992_v0  ;;  %v107_v15 = vld [vmem:[%s1294_s1 + $0x120] sm:$0xff]  ;;  %v109_v16 = vld [vmem:[%s1294_s1 + $0x130] sm:$0xff]  ;;  %v114_v20 = vld [vmem:[%s1294_s1 + $0x158] sm:$0xff]  ;;  %v877_v26 = vpack.c.bf16 %v20_v10, %v19_v9  ;;  %v134_v9 = vlaneseq }
   0x6   :  { %v896_v18 = vpack.c.bf16 %v109_v16, %v107_v15  ;;  %v111_v21 = vld [vmem:[%s1294_s1 + $0x140] sm:$0xff]  ;;  %v898_v22 = vpack.c.bf16 %v114_v20, %v112_v19  ;;  %v113_v23 = vld [vmem:[%s1294_s1 + $0x150] sm:$0xff]  ;;  %v116_v24 = vld [vmem:[%s1294_s1 + $0x168] sm:$0xff]  ;;  %895 = vmatprep.subr.bf16.mxu1 %v894_v17 }
   0x7   :  { %v118_v25 = vld [vmem:[%s1294_s1 + $0x178] sm:$0xff]  ;;  %v21_v27 = vld [vmem:[%s1294_s1 + $0x80] sm:$0xff]  ;;  %v900_v28 = vpack.c.bf16 %v113_v23, %v111_v21  ;;  %v22_v29 = vld [vmem:[%s1294_s1 + $0x90] sm:$0xff]  ;;  %v135_v10 = vshrl.u32 %v134_v9, 7  ;;  %v1000_v9 = vmov 4  }
   0x8   :  { %872 = vmatpush1.bf16.msra.mxu0 %v871_v6  ;;  %897 = vmatpush1.bf16.msra.mxu1 %v896_v18  ;;  %v902_v30 = vpack.c.bf16 %v118_v25, %v116_v24  ;;  %v115_v31 = vld [vmem:[%s1294_s1 + $0x160] sm:$0xff]  ;;  %v117_v32 = vld [vmem:[%s1294_s1 + $0x170] sm:$0xff]  ;;  %v120_v33 = vld [vmem:[%s1294_s1 + $0x188] sm:$0xff]  ;;  %v880_v35 = vpack.c.bf16 %v22_v29, %v21_v27 }
   0x9   :  { %873 = vmatprep.subr.bf16.mxu0 %v992_v0  ;;  %899 = vmatprep.subr.bf16.mxu1 %v898_v22  ;;  %v122_v34 = vld [vmem:[%s1294_s1 + $0x198] sm:$0xff]  ;;  %v23_v36 = vld [vmem:[%s1294_s1 + $0xa0] sm:$0xff]  ;;  %v904_v37 = vpack.c.bf16 %v117_v32, %v115_v31  ;;  %v24_v38 = vld [vmem:[%s1294_s1 + $0xb0] sm:$0xff]  ;;  %v136_v11 = vsub.s32 0, %v135_v10 }
   0xa   :  { %v906_v39 = vpack.c.bf16 %v122_v34, %v120_v33  ;;  %v119_v40 = vld [vmem:[%s1294_s1 + $0x180] sm:$0xff]  ;;  %v121_v41 = vld [vmem:[%s1294_s1 + $0x190] sm:$0xff]  ;;  %v124_v42 = vld [vmem:[%s1294_s1 + $0x1a8] sm:$0xff]  ;;  %v883_v44 = vpack.c.bf16 %v24_v38, %v23_v36  ;;  %v998_v36 = vmov 3  }
   0xb   :  { %v126_v43 = vld [vmem:[%s1294_s1 + $0x1b8] sm:$0xff]  ;;  %v25_v45 = vld [vmem:[%s1294_s1 + $0xc0] sm:$0xff]  ;;  %v908_v46 = vpack.c.bf16 %v121_v41, %v119_v40  ;;  %v26_v47 = vld [vmem:[%s1294_s1 + $0xd0] sm:$0xff]  ;;  %958 = vset.pattern.permute.xlu0 %v998_v36 }
   0xc   :  { %875 = vmatpush1.bf16.msra.mxu0 %v874_v13  ;;  %901 = vmatpush1.bf16.msra.mxu1 %v900_v28  ;;  %v910_v48 = vpack.c.bf16 %v126_v43, %v124_v42  ;;  %v123_v49 = vld [vmem:[%s1294_s1 + $0x1a0] sm:$0xff]  ;;  %v125_v50 = vld [vmem:[%s1294_s1 + $0x1b0] sm:$0xff]  ;;  %v886_v51 = vpack.c.bf16 %v26_v47, %v25_v45  ;;  %v128_v60 = vld [vmem:[%s1294_s1 + $0x1c8] sm:$0xff]  ;;  %v140_v13 = vsub.s32 1, %v135_v10 }
   0xd   :  { %876 = vmatprep.subr.bf16.mxu0 %v992_v0  ;;  %903 = vmatprep.subr.bf16.mxu1 %v902_v30  ;;  %v912_v52 = vpack.c.bf16 %v125_v50, %v123_v49  ;;  %v27_v53 = vld [vmem:[%s1294_s1 + $0xe0] sm:$0xff]  ;;  %v28_v54 = vld [vmem:[%s1294_s1 + $0xf0] sm:$0xff]  ;;  %v130_v61 = vld [vmem:[%s1294_s1 + $0x1d8] sm:$0xff] }
   0xe   :  { %v889_v55 = vpack.c.bf16 %v28_v54, %v27_v53  ;;  %v29_v56 = vld [vmem:[%s1294_s1 + $0x100] sm:$0xff]  ;;  %v30_v57 = vld [vmem:[%s1294_s1 + $0x110] sm:$0xff]  ;;  %v914_v62 = vpack.c.bf16 %v130_v61, %v128_v60 }
   0xf   :  { %v892_v58 = vpack.c.bf16 %v30_v57, %v29_v56  ;;  %v11_v59 = vld [vmem:[%s1295_s0] sm:$0xff]  ;;  %v129_v1 = vld [vmem:[%s1294_s1 + $0x1d0] sm:$0xff] }
  0x10   :  { %878 = vmatpush1.bf16.msra.mxu0 %v877_v26  ;;  %905 = vmatpush1.bf16.msra.mxu1 %v904_v37  ;;  %v127_v63 = vld [vmem:[%s1294_s1 + $0x1c0] sm:$0xff] }
  0x11   :  { %879 = vmatprep.subr.bf16.mxu0 %v992_v0  ;;  %907 = vmatprep.subr.bf16.mxu1 %v906_v39  ;;  %v916_v2 = vpack.c.bf16 %v129_v1, %v127_v63  ;;  %v31_v4 = vld [vmem:[%s1294_s1 + $0x300] ss:$0 sm:$0xff]  ;;  %v779_v12 = vld [vmem:[%s1294_s1 + $0x301] ss:$8 sm:$0x3] }
  0x12   :  { %v137_v14 = vrot.slane %v779_v12, %v136_v11  ;;  %v141_v15 = vrot.slane %v779_v12, %v140_v13  ;;  %v781_v20 = vld [vmem:[%s1294_s1 + $0x306] ss:$8 sm:$0x3]  ;;  %v240_v37 = vld [vmem:[%s1294_s1 + $0x302] ss:$0 sm:$0xff]  ;;  %v1002_v12 = vmov 1  }
  0x13   :  { %v227_v21 = vrot.slane %v781_v20, %v136_v11  ;;  %v231_v22 = vrot.slane %v781_v20, %v140_v13  ;;  %v1001_v11 = vmov 0  }
  0x14   :  { %881 = vmatpush1.bf16.msra.mxu0 %v880_v35  ;;  %909 = vmatpush1.bf16.msra.mxu1 %v908_v46  ;;  %v997_v35 = vmov 2  }
  0x15   :  { %882 = vmatprep.subr.bf16.mxu0 %v992_v0  ;;  %911 = vmatprep.subr.bf16.mxu1 %v910_v48 }
  0x16   :  { %957 = vset.pattern.permute.xlu1 %v997_v35  ;;  %v535_v35 = vld [vmem:[%s1294_s1 + $0x270] sm:$0xff] }
  0x18   :  { %884 = vmatpush1.bf16.msra.mxu0 %v883_v44  ;;  %913 = vmatpush1.bf16.msra.mxu1 %v912_v52 }
  0x19   :  { %885 = vmatprep.subr.bf16.mxu0 %v992_v0  ;;  %915 = vmatprep.subr.bf16.mxu1 %v914_v62 }
  0x1c   :  { %887 = vmatpush1.bf16.msra.mxu0 %v886_v51  ;;  %917 = vmatpush1.bf16.msra.mxu1 %v916_v2 }
  0x1d   :  { %888 = vmatprep.subr.bf16.mxu0 %v992_v0  ;;  %918 = vmatprep.subr.bf16.mxu1 %v992_v0 }
  0x20   :  { %890 = vmatpush1.bf16.msra.mxu0 %v889_v55 }
  0x21   :  { %891 = vmatprep.subr.bf16.mxu0 %v992_v0 }
  0x24   :  { %893 = vmatpush1.bf16.msra.mxu0 %v892_v58 }
  0x25   :  { %930 = vmatprep.subr.bf16.mxu0 %v992_v0 }
  0x27   :  { %101 = vmatmul.mubr.f32.vlgmr.msra.gmra.mrb[0].mxu0 %v11_v59 }
  0x28   :  { %846 = vmatprep.mubr.msk.f32.mxu0 %vm1003_vm3, %v993_v3 }
  0xfa   :  { %v102_v5 = vpop.f32.mrb[0].mxu0 }
  0xfb   :  { %v103_v6 = vadd.f32 %v102_v5, %v31_v4  ;;  %v104_v7 = vpop.f32.mrb[1].mxu0  ;;  %v999_v5 = vmov 5  }
  0xfd   :  { %v1167_v8 = vmax.f32 %v103_v6, 0.0 }
  0xff   :  { %780 = vmatmul.mubr.msk.f32.vlgmr.msra.gmra.mrb[0].mxu1 %vm144_vm1, %v1167_v8 }
 0x100   :  { %824 = vmatprep.mubr.msk.f32.mxu1 %vm1003_vm3, %v993_v3 }
 0x1d2   :  { %v214_v16 = vpop.f32.mrb[0].mxu1 }
 0x1d3   :  { %v215_v17 = vadd.f32 %v214_v16, %v137_v14  ;;  %v216_v18 = vpop.f32.mrb[1].mxu1 }
 0x1d4   :  { %v217_v19 = vadd.f32 %v216_v18, %v141_v15 }
 0x1d5   :  { %964 = vtanh.f32 %v215_v17 }
 0x1d6   :  { %966 = vtanh.f32 %v217_v19 }
 0x1df   :  { %v965_v23 = vpop.eup %964 }
 0x1e0   :  { %v967_v24 = vpop.eup %966  ;;  %v234_v25 = vmul.f32 %v965_v23, %v227_v21 }
 0x1e1   :  { %v235_v26 = vmul.f32 %v967_v24, %v231_v22 }
 0x1e2   :  { %262 = vrot.lane.b32.xlu0 %v234_v25, %s994_s18  ;;  %v237_v34 = vsel %vm236_vm2, %v234_v25, 0.0 }
 0x1e3   :  { %299 = vrot.lane.b32.xlu1 %v235_v26, %s995_s19  ;;  %v288_v30 = vsel %vm236_vm2, %v235_v26, 0.0 }
 0x1e6   :  { %275 = vrot.lane.b32.xlu0 %v234_v25, %s996_s20 }
 0x254   :  { %v263_v27 = vpop.permute.xlu0 %262 }
 0x255   :  { %v265_v28 = vsel %vm236_vm2, %v263_v27, 0.0  ;;  %v300_v32 = vpop.permute.xlu1 %299 }
 0x256   :  { %266 = vadd.xlane.f32.xlu1 %v265_v28  ;;  %v302_v33 = vsel %vm236_vm2, %v300_v32, 0.0 }
 0x258   :  { %v276_v29 = vpop.permute.xlu0 %275 }
 0x259   :  { %v278_v31 = vsel %vm236_vm2, %v276_v29, 0.0  ;;  %v382_v29 = vld [vmem:[%s1294_s1 + $0x220] sm:$0xff] }
 0x25a   :  { %289 = vadd.xlane.f32.xlu1 %v288_v30  ;;  %279 = vadd.xlane.f32.xlu0 %v278_v31  ;;  %v383_v30 = vld [vmem:[%s1294_s1 + $0x230] sm:$0xff]  ;;  %v384_v31 = vld [vmem:[%s1294_s1 + $0x240] sm:$0xff] }
 0x25b   :  { %v919_v32 = vpack.c.bf16 %v383_v30, %v382_v29 }
 0x25d   :  { %920 = vmatpush3.bf16.msra.mxu1 %v919_v32 }
 0x25e   :  { %303 = vadd.xlane.f32.xlu1 %v302_v33  ;;  %v385_v33 = vld [vmem:[%s1294_s1 + $0x250] sm:$0xff]  ;;  %921 = vmatprep.subr.bf16.mxu1 %v992_v0 }
 0x262   :  { %238 = vadd.xlane.f32.xlu1 %v237_v34  ;;  %v534_v34 = vld [vmem:[%s1294_s1 + $0x260] sm:$0xff] }
 0x263   :  { %v931_v36 = vpack.c.bf16 %v535_v35, %v534_v34 }
 0x265   :  { %932 = vmatpush3.bf16.msra.mxu0 %v931_v36 }
 0x266   :  { %933 = vmatprep.subr.bf16.mxu0 %v992_v0 }
 0x270   :  { %249 = vrot.lane.b32.xlu0 %v234_v25, %s995_s19 }
 0x2e3   :  { %v267_v38 = vpop.xlane.xlu1 %266 }
 0x2e4   :  { %v268_v39 = vadd.f32 %v267_v38, %v240_v37  ;;  %v536_v38 = vld [vmem:[%s1294_s1 + $0x280] sm:$0xff] }
 0x2e6   :  { %v784_v40 = vmul.f32 -1.442695, %v268_v39  ;;  %v537_v39 = vld [vmem:[%s1294_s1 + $0x290] sm:$0xff] }
 0x2e7   :  { %v290_v41 = vpop.xlane.xlu1 %289  ;;  %v280_v42 = vpop.xlane.xlu0 %279 }
 0x2e8   :  { %968 = vpow2.f32 %v784_v40  ;;  %v291_v43 = vadd.f32 %v290_v41, %v240_v37  ;;  %v281_v44 = vadd.f32 %v280_v42, %v240_v37  ;;  %v934_v40 = vpack.c.bf16 %v537_v39, %v536_v38 }
 0x2ea   :  { %v786_v45 = vmul.f32 -1.442695, %v291_v43  ;;  %v785_v46 = vmul.f32 -1.442695, %v281_v44  ;;  %935 = vmatpush3.bf16.msra.mxu0 %v934_v40 }
 0x2eb   :  { %v304_v47 = vpop.xlane.xlu1 %303  ;;  %v250_v48 = vpop.permute.xlu0 %249  ;;  %942 = vmatprep.subr.bf16.mxu0 %v992_v0 }
 0x2ec   :  { %v305_v49 = vadd.f32 %v304_v47, %v240_v37  ;;  %v252_v50 = vsel %vm236_vm2, %v250_v48, 0.0  ;;  %970 = vpow2.f32 %v785_v46 }
 0x2ed   :  { %253 = vadd.xlane.f32.xlu1 %v252_v50  ;;  %972 = vpow2.f32 %v786_v45 }
 0x2ee   :  { %v787_v51 = vmul.f32 -1.442695, %v305_v49 }
 0x2ef   :  { %v239_v52 = vpop.xlane.xlu1 %238 }
 0x2f0   :  { %974 = vpow2.f32 %v787_v51  ;;  %v241_v53 = vadd.f32 %v240_v37, %v239_v52  ;;  %v378_v51 = vld [vmem:[%s1294_s1 + $0x1e0] sm:$0xff]  ;;  %v379_v52 = vld [vmem:[%s1294_s1 + $0x1f0] sm:$0xff] }
 0x2f2   :  { %v969_v54 = vpop.eup %968  ;;  %v782_v55 = vmul.f32 -1.442695, %v241_v53  ;;  %v925_v53 = vpack.c.bf16 %v379_v52, %v378_v51 }
 0x2f3   :  { %v272_v56 = vadd.f32 1.0, %v969_v54  ;;  %v380_v54 = vld [vmem:[%s1294_s1 + $0x200] sm:$0xff] }
 0x2f4   :  { %976 = vpow2.f32 %v782_v55  ;;  %v381_v55 = vld [vmem:[%s1294_s1 + $0x210] sm:$0xff] }
 0x2f5   :  { %978 = vrcp.f32 %v272_v56 }
 0x2f6   :  { %v971_v57 = vpop.eup %970 }
 0x2f7   :  { %v973_v58 = vpop.eup %972  ;;  %v285_v59 = vadd.f32 1.0, %v971_v57 }
 0x2f8   :  { %v295_v61 = vadd.f32 1.0, %v973_v58  ;;  %v928_v58 = vpack.c.bf16 %v381_v55, %v380_v54 }
 0x2f9   :  { %980 = vrcp.f32 %v285_v59 }
 0x2fa   :  { %v975_v60 = vpop.eup %974 }
 0x2fb   :  { %v309_v62 = vadd.f32 1.0, %v975_v60 }
 0x2fd   :  { %982 = vrcp.f32 %v309_v62 }
 0x2fe   :  { %v977_v63 = vpop.eup %976  ;;  %984 = vrcp.f32 %v295_v61 }
 0x2ff   :  { %v979_v1 = vpop.eup %978  ;;  %v245_v2 = vadd.f32 1.0, %v977_v63  ;;  %v618_v63 = vld [vmem:[%s1294_s1 + $0x2b0] sm:$0xff] }
 0x300   :  { %336 = vperm.xlu1 %957, %v979_v1  }
 0x301   :  { %986 = vrcp.f32 %v245_v2  ;;  %v619_v2 = vld [vmem:[%s1294_s1 + $0x2c0] sm:$0xff] }
 0x303   :  { %v981_v4 = vpop.eup %980 }
 0x304   :  { %960 = vset.pattern.permute.xlu1 %v999_v5  ;;  %347 = vperm.xlu0 %958, %v981_v4  }
 0x307   :  { %v983_v6 = vpop.eup %982 }
 0x308   :  { %369 = vperm.xlu1 %960, %v983_v6   ;;  %v985_v7 = vpop.eup %984  ;;  %959 = vset.pattern.permute.xlu0 %v1000_v9 }
 0x309   :  { %358 = vperm.xlu0 %959, %v985_v7  }
 0x30b   :  { %v987_v10 = vpop.eup %986 }
 0x30c   :  { %962 = vset.pattern.permute.xlu1 %v1002_v12 }
 0x30d   :  { %961 = vset.pattern.permute.xlu0 %v1001_v11 }
 0x30e   :  { %314 = vperm.xlu0 %961, %v987_v10  }
 0x312   :  { %963 = vset.pattern.permute.xlu0 %v999_v5 }
 0x37a   :  { %v254_v13 = vpop.xlane.xlu1 %253 }
 0x37b   :  { %v255_v14 = vadd.f32 %v254_v13, %v240_v37  ;;  %v922_v37 = vpack.c.bf16 %v385_v33, %v384_v31 }
 0x37d   :  { %v783_v15 = vmul.f32 -1.442695, %v255_v14  ;;  %923 = vmatpush3.bf16.msra.mxu1 %v922_v37 }
 0x37e   :  { %924 = vmatprep.subr.bf16.mxu1 %v992_v0 }
 0x37f   :  { %988 = vpow2.f32 %v783_v15  ;;  %v337_v16 = vpop.permute.xlu1 %336 }
 0x380   :  { %v339_v27 = vmul.f32 %v337_v16, %v1167_v8  ;;  %v696_v16 = vld [vmem:[%s1294_s1 + $0x2e0] sm:$0xff] }
 0x383   :  { %v348_v17 = vpop.permute.xlu0 %347 }
 0x384   :  { %v350_v18 = vmul.f32 %v348_v17, %v1167_v8  ;;  %v697_v17 = vld [vmem:[%s1294_s1 + $0x2f0] sm:$0xff] }
 0x386   :  { %352 = vrot.lane.b32.xlu0 %v350_v18, %s995_s19  ;;  %v943_v18 = vpack.c.bf16 %v697_v17, %v696_v16 }
 0x387   :  { %v370_v19 = vpop.permute.xlu1 %369 }
 0x388   :  { %v372_v20 = vmul.f32 %v370_v19, %v1167_v8  ;;  %v359_v22 = vpop.permute.xlu0 %358  ;;  %v621_v19 = vld [vmem:[%s1294_s1 + $0x304] ss:$0 sm:$0xff] }
 0x389   :  { %v989_v21 = vpop.eup %988  ;;  %v361_v28 = vmul.f32 %v359_v22, %v1167_v8 }
 0x38a   :  { %v259_v23 = vadd.f32 1.0, %v989_v21  ;;  %374 = vrot.lane.b32.xlu0 %v372_v20, %s996_s20 }
 0x38c   :  { %990 = vrcp.f32 %v259_v23 }
 0x38d   :  { %v315_v24 = vpop.permute.xlu0 %314 }
 0x38e   :  { %v317_v25 = vmul.f32 %v315_v24, %v1167_v8  ;;  %v698_v24 = vld [vmem:[%s1294_s1 + $0x305] ss:$0 sm:$0xff] }
 0x390   :  { %319 = vrot.lane.b32.xlu0 %v317_v25, %s995_s19 }
 0x396   :  { %v991_v26 = vpop.eup %990 }
 0x397   :  { %325 = vperm.xlu1 %962, %v991_v26  }
 0x39b   :  { %341 = vrot.lane.b32.xlu1 %v339_v27, %s996_s20 }
 0x39f   :  { %363 = vrot.lane.b32.xlu1 %v361_v28, %s994_s18 }
 0x3f8   :  { %v353_v42 = vpop.permute.xlu0 %352 }
 0x3fc   :  { %v375_v48 = vpop.permute.xlu0 %374 }
 0x402   :  { %v320_v56 = vpop.permute.xlu0 %319 }
 0x403   :  { %v322_v59 = vadd.f32 %v320_v56, %v1167_v8 }
 0x416   :  { %v326_v41 = vpop.permute.xlu1 %325 }
 0x417   :  { %v328_v49 = vmul.f32 %v326_v41, %v1167_v8 }
 0x41a   :  { %v342_v43 = vpop.permute.xlu1 %341 }
 0x41b   :  { %v344_v44 = vadd.f32 %v342_v43, %v1167_v8 }
 0x41d   :  { %v355_v45 = vadd.f32 %v353_v42, %v344_v44 }
 0x41e   :  { %v364_v46 = vpop.permute.xlu1 %363 }
 0x41f   :  { %v366_v47 = vadd.f32 %v364_v46, %v1167_v8  ;;  %387 = vrot.lane.b32.xlu1 %v355_v45, %s995_s19  ;;  %v617_v8 = vld [vmem:[%s1294_s1 + $0x2a0] sm:$0xff] }
 0x420   :  { %v937_v1 = vpack.c.bf16 %v618_v63, %v617_v8 }
 0x421   :  { %v377_v50 = vadd.f32 %v375_v48, %v366_v47 }
 0x423   :  { %330 = vrot.lane.b32.xlu1 %v328_v49, %s994_s18  ;;  %539 = vrot.lane.b32.xlu0 %v377_v50, %s994_s18 }
 0x491   :  { %v388_v57 = vpop.permute.xlu1 %387 }
 0x492   :  { %825 = vmatmul.mubr.msk.f32.vlgmr.msra.gmra.mrb[2].mxu1 %vm236_vm2, %v388_v57 }
 0x493   :  { %926 = vmatpush3.bf16.msra.mxu1 %v925_v53  ;;  %835 = vmatprep.mubr.msk.f32.mxu1 %vm1003_vm3, %v993_v3 }
 0x494   :  { %927 = vmatprep.subr.bf16.mxu1 %v992_v0 }
 0x495   :  { %v540_v60 = vpop.permute.xlu0 %539  ;;  %v331_v61 = vpop.permute.xlu1 %330 }
 0x496   :  { %v333_v62 = vadd.f32 %v331_v61, %v322_v59  ;;  %847 = vmatmul.mubr.msk.f32.vlgmr.msra.gmra.mrb[2].mxu0 %vm236_vm2, %v540_v60 }
 0x497   :  { %929 = vmatpush3.bf16.msra.mxu1 %v928_v58  ;;  %864 = vmatprep.mubr.msk.f32.mxu0 %vm1003_vm3, %v993_v3 }
 0x498   :  { %936 = vmatprep.subr.bf16.mxu1 %v992_v0  ;;  %944 = vmatpush3.bf16.msra.mxu0 %v943_v18 }
 0x49a   :  { %836 = vmatmul.mubr.msk.f32.vlgmr.msra.gmra.mrb[4].mxu1 %vm236_vm2, %v333_v62 }
 0x49b   :  { %857 = vmatprep.mubr.msk.f32.mxu1 %vm1003_vm3, %v993_v3  ;;  %938 = vmatpush3.bf16.msra.mxu1 %v937_v1  ;;  %v620_v3 = vld [vmem:[%s1294_s1 + $0x2d0] sm:$0xff] }
 0x49c   :  { %939 = vmatprep.subr.bf16.mxu1 %v992_v0  ;;  %v940_v4 = vpack.c.bf16 %v620_v3, %v619_v2  ;;  %v614_v0 = vld [vmem:[%s1294_s1 + $0x303] ss:$0 sm:$0xff] }
 0x49f   :  { %941 = vmatpush3.bf16.msra.mxu1 %v940_v4 }
 0x565   :  { %v457_v5 = vpop.f32.mrb[2].mxu1 }
 0x566   :  { %v826_v6 = vpop.f32.mrb[3].mxu1 }
 0x569   :  { %v609_v7 = vpop.f32.mrb[2].mxu0 }
 0x56a   :  { %v848_v9 = vpop.f32.mrb[3].mxu0 }
 0x56d   :  { %v530_v10 = vpop.f32.mrb[4].mxu1 }
 0x56e   :  { %v531_v11 = vadd.f32 %v530_v10, %v457_v5  ;;  %v837_v12 = vpop.f32.mrb[5].mxu1 }
 0x570   :  { %v613_v13 = vadd.f32 %v609_v7, %v531_v11 }
 0x572   :  { %v615_v14 = vadd.f32 %v614_v0, %v613_v13 }
 0x574   :  { %v616_v15 = vmax.f32 %v615_v14, 0.0 }
 0x576   :  { %858 = vmatmul.mubr.msk.f32.vlgmr.msra.gmra.mrb[6].mxu1 %vm236_vm2, %v616_v15 }
 0x649   :  { %v691_v20 = vpop.f32.mrb[6].mxu1 }
 0x64a   :  { %v692_v21 = vadd.f32 %v691_v20, %v621_v19  ;;  %v859_v22 = vpop.f32.mrb[7].mxu1 }
 0x64c   :  { %v695_v23 = vmax.f32 %v692_v21, 0.0 }
 0x64e   :  { %865 = vmatmul.mubr.msk.f32.vlgmr.msra.gmra.mrb[4].mxu0 %vm32_vm0, %v695_v23 }
 0x721   :  { %v768_v25 = vpop.f32.mrb[4].mxu0 }
 0x722   :  { %v769_v26 = vadd.f32 %v768_v25, %v698_v24  ;;  %v866_v27 = vpop.f32.mrb[5].mxu0 }
 0x724   :  { %773 = vst.msk [vmem:[%s1296_s2] sm:$0xff] %vm772_vm4, %v769_v26 }

</bundles_post_ra>
